<compile_context>
chip_gen: v6e
topology: v6e:2x2x1
jax: 0.10.0
libtpu: 0.0.40
codegen_flags: <defaults>
</compile_context>

<pallas_src>
import jax
import jax.numpy as jnp
from jax.experimental import pallas as pl
from jax.experimental.pallas import tpu as pltpu


def _round_up(a, b):
    return ((a + b - 1) // b) * b


def _make_kernel(n, w_row0):
    def kernel(slab_ref, o_ref):
        # slab_ref: (slab_rows, K) f32 — rows [0:n] = mat1, rows
        #           [w_row0:w_row0+2] = W^T (sublane-8 aligned, no shift).
        # o_ref   : (n, 2) f32 — clipped matmul result only.
        slab = slab_ref[...]
        x = slab[:n, :]                       # (n, K), K on lane axis
        wt = slab[w_row0:w_row0 + 2, :]       # (2, K), K on lane axis

        # addmm with zero bias: VPU broadcast-multiply + XLU lane reduction
        # per output column (no in-kernel transpose, no MXU edge cases).
        c0 = jnp.sum(x * wt[0:1, :], axis=-1, keepdims=True)   # (n, 1)
        c1 = jnp.sum(x * wt[1:2, :], axis=-1, keepdims=True)   # (n, 1)
        v1 = jnp.concatenate([c0, c1], axis=-1)                 # (n, 2)

        # clamp(min=-1, max=1); single full-ref store of the 2-D result.
        o_ref[...] = jnp.clip(v1, -1.0, 1.0).astype(o_ref.dtype)

    return kernel


def model_forward(x2, w):
    """x2: (1, 3, 3, K) f32, w: (K, 2) f32 -> (2, 9, 2) f32."""
    n = 1
    for d in x2.shape[:-1]:
        n *= d
    k = x2.shape[-1]

    x_flat = x2.reshape(n, k).astype(jnp.float32)   # mat1, K on lanes
    w_t = w.astype(jnp.float32).T                   # (2, K), K on lanes

    # Fuse both operands into a single slab so the kernel needs exactly one
    # input DMA. W^T is placed at the next sublane-8-aligned row after mat1
    # so the in-kernel slice never crosses / shifts a (8,128) f32 tile.
    w_row0 = _round_up(n, 8)
    slab_rows = w_row0 + 8
    slab = jnp.zeros((slab_rows, k), jnp.float32)
    slab = slab.at[0:n, :].set(x_flat)
    slab = slab.at[w_row0:w_row0 + 2, :].set(w_t)

    vmem_spec = pl.BlockSpec(memory_space=pltpu.MemorySpace.VMEM)

    v3 = pl.pallas_call(
        _make_kernel(n, w_row0),
        out_shape=jax.ShapeDtypeStruct((n, 2), jnp.float32),
        in_specs=[vmem_spec],
        out_specs=vmem_spec,
        cost_estimate=pl.CostEstimate(
            flops=2 * n * k * 2,
            transcendentals=0,
            bytes_accessed=4 * (slab_rows * k + n * 2),
        ),
    )(slab)

    # view(1, -1, 2) and cat([v2, v4], 0) with v2 := zeros done in the wrapper
    # (free contiguous reshape + constant concat; XLA fuses with neighbours).
    v4 = v3.reshape(1, n, 2)
    v2 = jnp.zeros((1, n, 2), jnp.float32)
    return jnp.concatenate([v2, v4], axis=0)


if __name__ == "__main__":
    key = jax.random.PRNGKey(0)
    kx, kw = jax.random.split(key)

    x2 = jax.random.normal(kx, (1, 3, 3, 35), dtype=jnp.float32)
    w = jax.random.normal(kw, (35, 2), dtype=jnp.float32)

    out = model_forward(x2, w)
    jax.block_until_ready(out)

    # Reference check in plain JAX.
    ref_v1 = x2.reshape(9, 35) @ w
    ref_v4 = jnp.clip(ref_v1, -1.0, 1.0).reshape(1, 9, 2)
    ref = jnp.concatenate([jnp.zeros((1, 9, 2), jnp.float32), ref_v4], axis=0)
    assert out.shape == (2, 9, 2)
    assert jnp.allclose(out, ref, atol=1e-5), "mismatch vs reference"

    print("KERNEL_OK")
</pallas_src>

<mosaic_0001>
module attributes {stable_mosaic.version = 11 : i64} {
  func.func @kernel(%arg0: memref<24x35xf32, #tpu.memory_space<vmem>>, %arg1: memref<9x2xf32, #tpu.memory_space<vmem>>) attributes {dimension_semantics = [], scalar_prefetch = 0 : i64, scratch_operands = 0 : i64, tpu.core_type = #tpu.core_type<tc>} {
    %c0 = arith.constant 0 : index
    %c0_0 = arith.constant 0 : index
    %0 = vector.load %arg0[%c0, %c0_0] : memref<24x35xf32, #tpu.memory_space<vmem>>, vector<24x35xf32>
    %1 = vector.extract_strided_slice %0 {offsets = [0, 0], sizes = [9, 35], strides = [1, 1]} : vector<24x35xf32> to vector<9x35xf32>
    %2 = vector.extract_strided_slice %0 {offsets = [16, 0], sizes = [2, 35], strides = [1, 1]} : vector<24x35xf32> to vector<2x35xf32>
    %3 = vector.extract_strided_slice %2 {offsets = [0, 0], sizes = [1, 35], strides = [1, 1]} : vector<2x35xf32> to vector<1x35xf32>
    %4 = vector.broadcast %3 : vector<1x35xf32> to vector<9x35xf32>
    %5 = arith.mulf %1, %4 : vector<9x35xf32>
    %cst = arith.constant dense<0.000000e+00> : vector<9xf32>
    %6 = vector.multi_reduction <add>, %5, %cst [1] : vector<9x35xf32> to vector<9xf32>
    %7 = vector.shape_cast %6 : vector<9xf32> to vector<9x1xf32>
    %8 = vector.extract_strided_slice %2 {offsets = [1, 0], sizes = [1, 35], strides = [1, 1]} : vector<2x35xf32> to vector<1x35xf32>
    %9 = vector.broadcast %8 : vector<1x35xf32> to vector<9x35xf32>
    %10 = arith.mulf %1, %9 : vector<9x35xf32>
    %cst_1 = arith.constant dense<0.000000e+00> : vector<9xf32>
    %11 = vector.multi_reduction <add>, %10, %cst_1 [1] : vector<9x35xf32> to vector<9xf32>
    %12 = vector.shape_cast %11 : vector<9xf32> to vector<9x1xf32>
    %13 = tpu.concatenate %7, %12 in 1 : vector<9x1xf32>, vector<9x1xf32> -> vector<9x2xf32>
    %cst_2 = arith.constant -1.000000e+00 : f32
    %cst_3 = arith.constant 1.000000e+00 : f32
    %14 = vector.broadcast %cst_2 : f32 to vector<9x2xf32>
    %15 = arith.maximumf %14, %13 : vector<9x2xf32>
    %16 = vector.broadcast %cst_3 : f32 to vector<9x2xf32>
    %17 = arith.minimumf %16, %15 : vector<9x2xf32>
    %c0_4 = arith.constant 0 : index
    %c0_5 = arith.constant 0 : index
    %18 = vector.load %arg1[%c0_4, %c0_5] : memref<9x2xf32, #tpu.memory_space<vmem>>, vector<9x2xf32>
    tpu.vector_store %arg1[%c0_4, %c0_5], %17 {strides = array<i32>} : memref<9x2xf32, #tpu.memory_space<vmem>>, vector<9x2xf32>,
    return
  }
}

</mosaic_0001>

<bundles_post_ra>
// kernel: tpu_custom_call.1
= control target key start
LH: loop header
LB: loop body
LE: loop exit
PB: predicated region body
PF: predicated region fallthrough
CT: control target
= control target key end

     0   :  { %6 = vsyncpa [#allocation3], 0  ;;  %s94_s6 = smov [#allocation2]   ;;  %s116_s0 = inlined_call_operand.hbm [shape: f32[24,35], index: 0, kind: input, shape index: {}]   ;;  %s117_s1 = inlined_call_operand.vmem [shape: f32[9,2], index: 1, kind: output, shape index: {}]  }
   0x1   :  { %s12_s7 = sshll.u32 %s94_s6, 4  ;;  %s13_s7 = int_to_ptr.vmem [resolvable:$true] %s12_s7 }
   0x2   :  { %s80_s8 = scalar_lea.vmem %s13_s7, 384  ;;  %p85_p1 = scmp.lt.s32.totalorder %s13_s7, %s13_s7 }
   0x3   :  { %p81_p0 = scmp.ne.s32.totalorder %s13_s7, %s80_s8  ;;  %p86_p2 = scmp.lt.s32.totalorder %s80_s8, %s80_s8 }
   0x5   :  { %p87_p3 = por %p86_p2, %p85_p1 }
   0x7   :  { %p88_p4 = pnand %p87_p3, %p81_p0 }
   0x9   :  { %91 = shalt.err (!%p88_p4)
}
   0xa   :  { %s95_s9 = smov 128   ;;  %s96_s10 = smov 8  }
   0xb   :  { %18 = dma.hbm_to_vmem [thread:$0]  %s116_s0, 384, %s13_s7, [#allocation3], %s95_s9, %s95_s9, %s96_s10  }
   0xc   :  { %92 = dma.done.wait [#allocation3], 384  }
   0xd   :  { %93 = vsyncadd [#allocation3], 4294966912  ;;  %v25_v0 = vlaneseq  ;;  %v22_v4 = vld [vmem:[#allocation2] sm:$0xff]  ;;  %v24_v5 = vld [vmem:[#allocation2 + $0x10] sm:$0xff]  ;;  %vm31_vm0 = vcmask 285696   ;;  %vm35_vm1 = vcmask 278528  }
   0xe   :  { %v23_v6 = vld [vmem:[#allocation2 + $0x8] sm:$0xff]  ;;  %vm51_vm2 = vcmask 7168   ;;  %vm58_vm3 = vcmask 15360   ;;  %vm60_vm4 = vcmask 8192  }
   0xf   :  { %v26_v1 = vshrl.u32 %v25_v0, 7 }
  0x11   :  { %v41_v2 = vsub.s32 1, %v26_v1  ;;  %v27_v3 = vsub.s32 0, %v26_v1 }
  0x13   :  { %v42_v7 = vrot.slane %v24_v5, %v41_v2  ;;  %v28_v8 = vrot.slane %v24_v5, %v27_v3 }
  0x15   :  { %v43_v9 = vmul.f32 %v42_v7, %v22_v4  ;;  %v29_v10 = vmul.f32 %v28_v8, %v22_v4  ;;  %v44_v11 = vmul.f32 %v42_v7, %v23_v6  ;;  %v30_v12 = vmul.f32 %v28_v8, %v23_v6 }
  0x17   :  { %v45_v13 = vsel %vm31_vm0, %v43_v9, 0.0  ;;  %v32_v14 = vsel %vm31_vm0, %v29_v10, 0.0  ;;  %v48_v15 = vsel %vm35_vm1, %v44_v11, 0.0  ;;  %v36_v16 = vsel %vm35_vm1, %v30_v12, 0.0 }
  0x18   :  { %46 = vadd.xlane.f32.xlu1 %v45_v13  ;;  %33 = vadd.xlane.f32.xlu0 %v32_v14 }
  0x1c   :  { %49 = vadd.xlane.f32.xlu1 %v48_v15  ;;  %37 = vadd.xlane.f32.xlu0 %v36_v16 }
  0xa1   :  { %v47_v17 = vpop.xlane.xlu1 %46  ;;  %v34_v18 = vpop.xlane.xlu0 %33 }
  0xa2   :  { %v52_v19 = vsel %vm51_vm2, %v34_v18, %v47_v17 }
  0xa3   :  { %v67_v20 = vclamps-f32 %v52_v19, 1.0 }
  0xa5   :  { %59 = vst.msk [vmem:[%s117_s1] sm:$0xff] %vm58_vm3, %v67_v20  ;;  %v50_v21 = vpop.xlane.xlu1 %49  ;;  %v38_v22 = vpop.xlane.xlu0 %37 }
  0xa6   :  { %v53_v23 = vsel %vm51_vm2, %v38_v22, %v50_v21 }
  0xa7   :  { %v68_v24 = vclamps-f32 %v53_v23, 1.0 }
  0xa9   :  { %61 = vst.msk [vmem:[%s117_s1 + $0x8] sm:$0x1] %vm60_vm4, %v68_v24 }
  0xaa   :  { %66 = vsyncpa [#allocation3], 1 }

</bundles_post_ra>
